<compile_context>
chip_gen: v6e
topology: v6e:2x2x1
jax: 0.10.0
libtpu: 0.0.40
codegen_flags: <defaults>
</compile_context>

<pallas_src>
import math
from functools import partial

import jax
import jax.numpy as jnp
import numpy as np
from jax.experimental import pallas as pl
from jax.experimental.pallas import tpu as pltpu


# ----------------------------------------------------------------------------
# helpers
# ----------------------------------------------------------------------------
def _pick_tile(dim, max_tile, align):
    """Largest tile <= max_tile that divides `dim` and is a multiple of `align`.
    Falls back to the full dimension (always a legal block)."""
    t = min(max_tile, dim)
    t -= t % align
    while t >= align:
        if dim % t == 0:
            return t
        t -= align
    return dim


# ----------------------------------------------------------------------------
# Tiled, pipelined matmul (fused QKV projection and output projection)
# ----------------------------------------------------------------------------
def _matmul_kernel(x_ref, w_ref, o_ref, acc_ref):
    @pl.when(pl.program_id(2) == 0)
    def _():
        acc_ref[...] = jnp.zeros(acc_ref.shape, acc_ref.dtype)

    acc_ref[...] += jnp.dot(x_ref[...], w_ref[...],
                            preferred_element_type=jnp.float32)

    @pl.when(pl.program_id(2) == pl.num_programs(2) - 1)
    def _():
        o_ref[...] = acc_ref[...].astype(o_ref.dtype)


def linear_pallas(x, w, out_dtype=jnp.float32, *, tm=512, tn=512, tk=1024):
    """y = x @ w  (w laid out (in, out) = PyTorch weight.T).
    bf16 MXU inputs, f32 accumulation in VMEM scratch, K axis pipelined."""
    x = x.astype(jnp.bfloat16)
    w = w.astype(jnp.bfloat16)
    M, K = x.shape
    K2, N = w.shape
    assert K == K2
    assert M % 8 == 0 and K % 128 == 0 and N % 128 == 0, \
        "linear_pallas expects M % 8 == 0 and K, N % 128 == 0 (pad inputs otherwise)"
    tm = _pick_tile(M, tm, 8)
    tn = _pick_tile(N, tn, 128)
    tk = _pick_tile(K, tk, 128)
    grid = (M // tm, N // tn, K // tk)
    # TODO(synk): for GEMV-like shapes (tiny M, e.g. single-token decode) a wide-N lane-dense
    # layout or plain XLA matmul would beat this tiling; not needed for prefill.
    return pl.pallas_call(
        _matmul_kernel,
        out_shape=jax.ShapeDtypeStruct((M, N), out_dtype),
        grid=grid,
        in_specs=[
            pl.BlockSpec((tm, tk), lambda i, j, k: (i, k)),
            pl.BlockSpec((tk, tn), lambda i, j, k: (k, j)),
        ],
        out_specs=pl.BlockSpec((tm, tn), lambda i, j, k: (i, j)),
        scratch_shapes=[pltpu.VMEM((tm, tn), jnp.float32)],
        compiler_params=pltpu.CompilerParams(
            dimension_semantics=("parallel", "parallel", "arbitrary"),
            vmem_limit_bytes=32 * 1024 * 1024,
        ),
    )(x, w)


# ----------------------------------------------------------------------------
# One-shot rotary embedding over the q/k thirds of the fused QKV projection
# ----------------------------------------------------------------------------
def _rope_kernel(x_ref, cos_ref, sin_ref, o_ref, *, half):
    x = x_ref[...].astype(jnp.float32)                   # (st, D)
    rolled = pltpu.roll(x, shift=half, axis=1)           # rotate_half; sign folded into sin
    o_ref[...] = (x * cos_ref[...] + rolled * sin_ref[...]).astype(o_ref.dtype)


def rope_qk_pallas(qkv, cos_pos, sin_signed_pos, *, num_heads, head_dim, s_tile=512):
    """qkv: (B, S, 3*H*D) bf16.  cos/sin_signed: (B, S, D) f32 (rotate_half sign folded in).
    Returns (B, S, 2*H*D) bf16 = [rope(q heads) | rope(k heads)], head-major columns."""
    B, S, threeh = qkv.shape
    H, D = num_heads, head_dim
    assert threeh == 3 * H * D
    st = _pick_tile(S, s_tile, 8)
    grid = (B, S // st, 2 * H)
    kernel = partial(_rope_kernel, half=D // 2)
    return pl.pallas_call(
        kernel,
        out_shape=jax.ShapeDtypeStruct((B, S, 2 * H * D), jnp.bfloat16),
        grid=grid,
        in_specs=[
            pl.BlockSpec((None, st, D), lambda b, si, hh: (b, si, hh)),  # q/k head column block
            pl.BlockSpec((None, st, D), lambda b, si, hh: (b, si, 0)),
            pl.BlockSpec((None, st, D), lambda b, si, hh: (b, si, 0)),
        ],
        out_specs=pl.BlockSpec((None, st, D), lambda b, si, hh: (b, si, hh)),
        compiler_params=pltpu.CompilerParams(
            dimension_semantics=("parallel", "parallel", "parallel"),
            vmem_limit_bytes=32 * 1024 * 1024,
        ),
    )(qkv, cos_pos, sin_signed_pos)


# ----------------------------------------------------------------------------
# Flash attention (pre-rotated q/k, online softmax)
# ----------------------------------------------------------------------------
def _flash_init(m_ref, l_ref, acc_ref):
    m_ref[...] = jnp.full(m_ref.shape, -1e30, m_ref.dtype)   # finite floor, no -inf NaNs
    l_ref[...] = jnp.zeros(l_ref.shape, l_ref.dtype)
    acc_ref[...] = jnp.zeros(acc_ref.shape, acc_ref.dtype)


def _online_softmax_step(s, v, m_ref, l_ref, acc_ref):
    m_prev = m_ref[...]
    m_new = jnp.maximum(m_prev, jnp.max(s, axis=-1, keepdims=True))
    alpha = jnp.exp(m_prev - m_new)
    p = jnp.exp(s - m_new)
    l_ref[...] = alpha * l_ref[...] + jnp.sum(p, axis=-1, keepdims=True)
    acc_ref[...] = alpha * acc_ref[...] + jnp.dot(
        p.astype(jnp.bfloat16), v, preferred_element_type=jnp.float32)
    m_ref[...] = m_new


def _flash_finalize(o_ref, l_ref, acc_ref):
    # approx reciprocal (EUP slot): ~1e-3 relative error, fine for bf16 outputs.
    o_ref[...] = (acc_ref[...] * pl.reciprocal(l_ref[...], approx=True)).astype(o_ref.dtype)


def _flash_causal_kernel(q_ref, k_ref, v_ref, o_ref, m_ref, l_ref, acc_ref,
                         *, sq, kt, mask_neg):
    qi = pl.program_id(2)
    ki = pl.program_id(3)

    @pl.when(ki == 0)
    def _():
        _flash_init(m_ref, l_ref, acc_ref)

    # Skip KV tiles that lie entirely above the causal diagonal.
    @pl.when(ki * kt < (qi + 1) * sq)
    def _():
        s = jax.lax.dot_general(q_ref[...], k_ref[...], (((1,), (1,)), ((), ())),
                                preferred_element_type=jnp.float32)
        # in-kernel causal additive mask (matches reference: + mask_neg where k > q)
        q_pos = qi * sq + jax.lax.broadcasted_iota(jnp.int32, (sq, kt), 0)
        k_pos = ki * kt + jax.lax.broadcasted_iota(jnp.int32, (sq, kt), 1)
        s = jnp.where(k_pos <= q_pos, s, s + mask_neg)
        _online_softmax_step(s, v_ref[...], m_ref, l_ref, acc_ref)

    @pl.when(ki == pl.num_programs(3) - 1)
    def _():
        _flash_finalize(o_ref, l_ref, acc_ref)


def _flash_masked_kernel(q_ref, k_ref, v_ref, mask_ref, o_ref, m_ref, l_ref, acc_ref):
    ki = pl.program_id(3)

    @pl.when(ki == 0)
    def _():
        _flash_init(m_ref, l_ref, acc_ref)

    s = jax.lax.dot_general(q_ref[...], k_ref[...], (((1,), (1,)), ((), ())),
                            preferred_element_type=jnp.float32)
    s = s + mask_ref[...].astype(jnp.float32)
    _online_softmax_step(s, v_ref[...], m_ref, l_ref, acc_ref)

    @pl.when(ki == pl.num_programs(3) - 1)
    def _():
        _flash_finalize(o_ref, l_ref, acc_ref)


def flash_attention_pallas(qk_rot, qkv, *, num_heads, head_dim, mask_neg,
                           attention_mask=None, sq_tile=512, kv_tile=512):
    """qk_rot: (B, S, 2*H*D) bf16 rotated q|k.  qkv: (B, S, 3*H*D) bf16 (v read from last third).
    attention_mask None -> in-kernel causal mask with mask_neg; else stream the (B,1,S,S) mask.
    Returns (B, S, H*D) bf16 (heads already concatenated)."""
    B, S, _ = qkv.shape
    H, D = num_heads, head_dim
    hidden = H * D
    sq = _pick_tile(S, sq_tile, 8)
    kt = _pick_tile(S, kv_tile, 8)
    grid = (B, H, S // sq, S // kt)

    q_spec = pl.BlockSpec((None, sq, D), lambda b, h, qi, ki: (b, qi, h))
    k_spec = pl.BlockSpec((None, kt, D), lambda b, h, qi, ki: (b, ki, H + h))
    v_spec = pl.BlockSpec((None, kt, D), lambda b, h, qi, ki: (b, ki, 2 * H + h))
    out_spec = pl.BlockSpec((None, sq, D), lambda b, h, qi, ki: (b, qi, h))
    scratch = [pltpu.VMEM((sq, 1), jnp.float32),    # running max
               pltpu.VMEM((sq, 1), jnp.float32),    # running denominator
               pltpu.VMEM((sq, D), jnp.float32)]    # output accumulator
    cparams = pltpu.CompilerParams(
        dimension_semantics=("parallel", "parallel", "parallel", "arbitrary"),
        vmem_limit_bytes=32 * 1024 * 1024)
    out_shape = jax.ShapeDtypeStruct((B, S, hidden), jnp.bfloat16)
    # TODO(synk): head_dim=128 fills only half of the 256-wide MXU on the PV matmul
    # (v6e/v7x); processing two heads per grid step would recover that.

    if attention_mask is None:
        kernel = partial(_flash_causal_kernel, sq=sq, kt=kt, mask_neg=float(mask_neg))
        return pl.pallas_call(
            kernel, out_shape=out_shape, grid=grid,
            in_specs=[q_spec, k_spec, v_spec],
            out_specs=out_spec, scratch_shapes=scratch, compiler_params=cparams,
        )(qk_rot, qk_rot, qkv)
    else:
        mask = attention_mask.astype(jnp.bfloat16)   # halve the O(S^2) mask stream
        mask_spec = pl.BlockSpec((None, None, sq, kt), lambda b, h, qi, ki: (b, 0, qi, ki))
        return pl.pallas_call(
            _flash_masked_kernel, out_shape=out_shape, grid=grid,
            in_specs=[q_spec, k_spec, v_spec, mask_spec],
            out_specs=out_spec, scratch_shapes=scratch, compiler_params=cparams,
        )(qk_rot, qk_rot, qkv, mask)


# ----------------------------------------------------------------------------
# Rotary cache (mirrors LlamaRotaryEmbedding buffers)
# ----------------------------------------------------------------------------
def rotary_cache(head_dim, max_pos, base=10000.0):
    inv_freq = 1.0 / (base ** (jnp.arange(0, head_dim, 2, dtype=jnp.float32) / head_dim))
    t = jnp.arange(max_pos, dtype=jnp.float32)
    freqs = jnp.einsum("i,j->ij", t, inv_freq)
    emb = jnp.concatenate([freqs, freqs], axis=-1)          # (max_pos, head_dim)
    cos, sin = jnp.cos(emb), jnp.sin(emb)
    half = head_dim // 2
    # fold rotate_half's sign: rope(x) = x*cos + roll(x, D/2)*sin_signed
    sin_signed = jnp.concatenate([-sin[:, :half], sin[:, half:]], axis=-1)
    return cos, sin, sin_signed


# ----------------------------------------------------------------------------
# Module wrapper
# ----------------------------------------------------------------------------
class LlamaAttentionPallas:
    def __init__(self, hidden_size, num_heads, max_position_embeddings=64,
                 mask_neg=-50.0, key=jax.random.PRNGKey(0)):
        self.hidden_size = hidden_size
        self.num_heads = num_heads
        self.head_dim = hidden_size // num_heads
        self.mask_neg = float(mask_neg)
        assert self.head_dim * num_heads == hidden_size
        # per-head q/k/v column blocks in the kernels are head_dim lanes wide
        assert self.head_dim % 128 == 0, "head_dim must be a multiple of the 128-lane width"
        # TODO(synk): head_dim 64/80 variants would need lane padding of the head blocks.
        k1, k2, k3, k4 = jax.random.split(key, 4)
        scale = 0.02
        # Stored transposed, (in, out) = PyTorch W.T, so the kernels compute x @ W.T.
        wq_t = scale * jax.random.normal(k1, (hidden_size, hidden_size), jnp.float32)
        wk_t = scale * jax.random.normal(k2, (hidden_size, hidden_size), jnp.float32)
        wv_t = scale * jax.random.normal(k3, (hidden_size, hidden_size), jnp.float32)
        wo_t = scale * jax.random.normal(k4, (hidden_size, hidden_size), jnp.float32)
        # Fused QKV weight (bf16 for the MXU); 1/sqrt(head_dim) folded into the q block
        # (rotary is linear, so scaling q == scaling the attention scores).
        self.w_qkv_t = jnp.concatenate(
            [wq_t / math.sqrt(self.head_dim), wk_t, wv_t], axis=1
        ).astype(jnp.bfloat16)
        self.w_o_t = wo_t.astype(jnp.bfloat16)
        self.cos_cached, self.sin_cached, self.sin_signed_cached = rotary_cache(
            self.head_dim, max_position_embeddings)

    def __call__(self, hidden_states, attention_mask=None, position_ids=None,
                 assume_causal_mask=True):
        bsz, q_len, _ = hidden_states.shape
        H, D = self.num_heads, self.head_dim
        if position_ids is None:
            position_ids = jnp.broadcast_to(jnp.arange(q_len, dtype=jnp.int32), (bsz, q_len))

        # fused q/k/v projection -> (B*S, 3*hidden) bf16
        x2d = hidden_states.reshape(bsz * q_len, self.hidden_size)
        qkv = linear_pallas(x2d, self.w_qkv_t, out_dtype=jnp.bfloat16)
        qkv = qkv.reshape(bsz, q_len, 3 * self.hidden_size)

        # rotary applied exactly once to q and k (sign folded into sin table)
        cos_pos = jnp.take(self.cos_cached, position_ids, axis=0)          # (B, S, D)
        sin_signed_pos = jnp.take(self.sin_signed_cached, position_ids, axis=0)
        qk_rot = rope_qk_pallas(qkv, cos_pos, sin_signed_pos,
                                num_heads=H, head_dim=D)                    # (B, S, 2*hidden)

        # flash attention: in-kernel causal mask (fast path) or streamed arbitrary mask
        mask_arg = None if (assume_causal_mask or attention_mask is None) else attention_mask
        attn_out = flash_attention_pallas(qk_rot, qkv, num_heads=H, head_dim=D,
                                          mask_neg=self.mask_neg,
                                          attention_mask=mask_arg)          # (B, S, hidden)

        out = linear_pallas(attn_out.reshape(bsz * q_len, self.hidden_size),
                            self.w_o_t, out_dtype=jnp.float32)
        return out.reshape(bsz, q_len, self.hidden_size)
        # TODO(synk): past_key_value / use_cache return path not implemented (static no-cache
        # prefill only); present_key_value would be the rotated (k, v) slices here.


# ----------------------------------------------------------------------------
# Pure-JAX reference (mirror of the PyTorch forward) for validation
# ----------------------------------------------------------------------------
def reference_forward(attn, hidden_states, attention_mask, position_ids):
    bsz, q_len, _ = hidden_states.shape
    H, D, hid = attn.num_heads, attn.head_dim, attn.hidden_size
    hp = jax.lax.Precision.HIGHEST
    w_qkv = attn.w_qkv_t.astype(jnp.float32)
    wq = w_qkv[:, :hid] * math.sqrt(D)      # undo the folded 1/sqrt(head_dim)
    wk = w_qkv[:, hid:2 * hid]
    wv = w_qkv[:, 2 * hid:]
    wo = attn.w_o_t.astype(jnp.float32)

    def shape(x):
        return x.reshape(bsz, q_len, H, D).transpose(0, 2, 1, 3)

    q = shape(jnp.matmul(hidden_states, wq, precision=hp))
    k = shape(jnp.matmul(hidden_states, wk, precision=hp))
    v = shape(jnp.matmul(hidden_states, wv, precision=hp))

    cos = attn.cos_cached[position_ids][:, None, :, :]   # (B, 1, S, D)
    sin = attn.sin_cached[position_ids][:, None, :, :]

    def rotate_half(x):
        h2 = x.shape[-1] // 2
        return jnp.concatenate([-x[..., h2:], x[..., :h2]], axis=-1)

    q = q * cos + rotate_half(q) * sin
    k = k * cos + rotate_half(k) * sin

    scores = jnp.matmul(q, jnp.swapaxes(k, 2, 3), precision=hp) / math.sqrt(D)
    scores = scores + attention_mask
    w = jax.nn.softmax(scores.astype(jnp.float32), axis=-1)
    o = jnp.matmul(w, v, precision=hp)
    o = o.transpose(0, 2, 1, 3).reshape(bsz, q_len, hid)
    return jnp.matmul(o, wo, precision=hp)


# ----------------------------------------------------------------------------
if __name__ == "__main__":
    bsz, q_len = 2, 8
    num_heads, head_dim = 2, 128          # head_dim matches real Llama (one 128-lane block)
    hidden = num_heads * head_dim         # 256
    mask_neg = -50.0                      # config.mask_neg

    root = jax.random.PRNGKey(0)
    k_params, k_x = jax.random.split(root)

    attn = LlamaAttentionPallas(hidden, num_heads, max_position_embeddings=64,
                                mask_neg=mask_neg, key=k_params)

    hidden_states = jax.random.normal(k_x, (bsz, q_len, hidden), jnp.float32)
    position_ids = jnp.broadcast_to(jnp.arange(q_len, dtype=jnp.int32), (bsz, q_len))
    causal = jnp.tril(jnp.ones((q_len, q_len), dtype=bool))
    attention_mask = jnp.where(causal, 0.0, mask_neg).astype(jnp.float32)
    attention_mask = jnp.broadcast_to(attention_mask[None, None], (bsz, 1, q_len, q_len))

    ref = reference_forward(attn, hidden_states, attention_mask, position_ids)

    # Fast path: in-kernel causal mask, dead-tile skip.
    out_causal = attn(hidden_states, attention_mask, position_ids, assume_causal_mask=True)
    out_causal = jax.block_until_ready(out_causal)
    np.testing.assert_allclose(np.asarray(out_causal), np.asarray(ref), atol=5e-3, rtol=2e-2)

    # Fallback path: arbitrary additive mask streamed as bf16.
    out_masked = attn(hidden_states, attention_mask, position_ids, assume_causal_mask=False)
    out_masked = jax.block_until_ready(out_masked)
    np.testing.assert_allclose(np.asarray(out_masked), np.asarray(ref), atol=5e-3, rtol=2e-2)

    print("KERNEL_OK")
</pallas_src>

<mosaic_0001>
module attributes {stable_mosaic.version = 11 : i64} {
  func.func @_matmul_kernel(%arg0: i32, %arg1: i32, %arg2: i32, %arg3: memref<16x256xbf16, #tpu.memory_space<vmem>>, %arg4: memref<256x384xbf16, #tpu.memory_space<vmem>>, %arg5: memref<16x384xbf16, #tpu.memory_space<vmem>>, %arg6: memref<16x384xf32, #tpu.memory_space<vmem>>) attributes {dimension_semantics = [#tpu.dimension_semantics<parallel>, #tpu.dimension_semantics<parallel>, #tpu.dimension_semantics<arbitrary>], iteration_bounds = array<i64: 1, 2, 1>, scalar_prefetch = 0 : i64, scratch_operands = 1 : i64, tpu.core_type = #tpu.core_type<tc>, window_params = [{transform_indices = @transform_0, window_bounds = array<i64: 16, 256>}, {transform_indices = @transform_1, window_bounds = array<i64: 256, 384>}, {transform_indices = @transform_2, window_bounds = array<i64: 16, 384>}]} {
    %c0_i32 = arith.constant 0 : i32
    %0 = arith.cmpi eq, %arg2, %c0_i32 : i32
    %1 = arith.extui %0 : i1 to i32
    %c0_i32_0 = arith.constant 0 : i32
    %2 = arith.cmpi ne, %1, %c0_i32_0 : i32
    scf.if %2 {
      %cst_10 = arith.constant 0.000000e+00 : f32
      %12 = vector.broadcast %cst_10 : f32 to vector<16x384xf32>
      %c0_11 = arith.constant 0 : index
      %c0_12 = arith.constant 0 : index
      %13 = vector.load %arg6[%c0_11, %c0_12] : memref<16x384xf32, #tpu.memory_space<vmem>>, vector<16x384xf32>
      tpu.vector_store %arg6[%c0_11, %c0_12], %12 {strides = array<i32>} : memref<16x384xf32, #tpu.memory_space<vmem>>, vector<16x384xf32>,
    } else {
    }
    %c0 = arith.constant 0 : index
    %c0_1 = arith.constant 0 : index
    %3 = vector.load %arg6[%c0, %c0_1] : memref<16x384xf32, #tpu.memory_space<vmem>>, vector<16x384xf32>
    %c0_2 = arith.constant 0 : index
    %c0_3 = arith.constant 0 : index
    %4 = vector.load %arg3[%c0_2, %c0_3] : memref<16x256xbf16, #tpu.memory_space<vmem>>, vector<16x256xbf16>
    %c0_4 = arith.constant 0 : index
    %c0_5 = arith.constant 0 : index
    %5 = vector.load %arg4[%c0_4, %c0_5] : memref<256x384xbf16, #tpu.memory_space<vmem>>, vector<256x384xbf16>
    %cst = arith.constant dense<0.000000e+00> : vector<16x384xf32>
    %6 = tpu.matmul %4, %5, %cst {dimension_numbers = #tpu.dot_dimension_numbers<[1], [0], [0], [1], [0, 0, 1, 1], [], []>} : vector<16x256xbf16>, vector<256x384xbf16>, vector<16x384xf32> -> vector<16x384xf32>
    %7 = arith.addf %3, %6 : vector<16x384xf32>
    %c0_6 = arith.constant 0 : index
    %c0_7 = arith.constant 0 : index
    %8 = vector.load %arg6[%c0_6, %c0_7] : memref<16x384xf32, #tpu.memory_space<vmem>>, vector<16x384xf32>
    tpu.vector_store %arg6[%c0_6, %c0_7], %7 {strides = array<i32>} : memref<16x384xf32, #tpu.memory_space<vmem>>, vector<16x384xf32>,
    %c0_i32_8 = arith.constant 0 : i32
    %9 = arith.cmpi eq, %arg2, %c0_i32_8 : i32
    %10 = arith.extui %9 : i1 to i32
    %c0_i32_9 = arith.constant 0 : i32
    %11 = arith.cmpi ne, %10, %c0_i32_9 : i32
    scf.if %11 {
      %c0_10 = arith.constant 0 : index
      %c0_11 = arith.constant 0 : index
      %12 = vector.load %arg6[%c0_10, %c0_11] : memref<16x384xf32, #tpu.memory_space<vmem>>, vector<16x384xf32>
      %13 = arith.truncf %12 : vector<16x384xf32> to vector<16x384xbf16>
      %c0_12 = arith.constant 0 : index
      %c0_13 = arith.constant 0 : index
      %14 = vector.load %arg5[%c0_12, %c0_13] : memref<16x384xbf16, #tpu.memory_space<vmem>>, vector<16x384xbf16>
      tpu.vector_store %arg5[%c0_12, %c0_13], %13 {strides = array<i32>} : memref<16x384xbf16, #tpu.memory_space<vmem>>, vector<16x384xbf16>,
    } else {
    }
    return
  }
  func.func @transform_0(%arg0: i32, %arg1: i32, %arg2: i32) -> (i32, i32) {
    %c0_i32 = arith.constant 0 : i32
    return %arg0, %arg2 : i32, i32
  }
  func.func @transform_1(%arg0: i32, %arg1: i32, %arg2: i32) -> (i32, i32) {
    %c0_i32 = arith.constant 0 : i32
    return %arg2, %arg1 : i32, i32
  }
  func.func @transform_2(%arg0: i32, %arg1: i32, %arg2: i32) -> (i32, i32) {
    %c0_i32 = arith.constant 0 : i32
    return %arg0, %arg1 : i32, i32
  }
}

</mosaic_0001>

<bundles_post_ra>
// kernel: tpu_custom_call.1
= control target key start
LH: loop header
LB: loop body
LE: loop exit
PB: predicated region body
PF: predicated region fallthrough
CT: control target
= control target key end

     0   :  { %7 = vsyncpa [#allocation4], 0  ;;  %s1468_s0 = inlined_call_operand.hbm [shape: bf16[16,256], index: 0, kind: input, shape index: {}]   ;;  %s1469_s1 = inlined_call_operand.hbm [shape: bf16[256,768], index: 1, kind: input, shape index: {}]   ;;  %s1470_s2 = inlined_call_operand.hbm [shape: bf16[16,768], index: 2, kind: output, shape index: {}]  }
   0x1   :  { %8 = vsyncpa [#allocation7], 0 }
   0x2   :  { %10 = vsyncpa [#allocation7 + $0x1], 0 }
   0x3   :  { %11 = vsyncpa [#allocation5], 0 }
   0x4   :  { %13 = vsyncpa [#allocation5 + $0x1], 0  ;;  %s1234_s9 = smov 0   ;;  %s1236_s10 = smov 0  }
   0x5   :  { %s1238_s11 = smov 0   ;;  %s1240_s12 = smov 0  }
   0x6   :  { %s1242_s13 = smov 0   ;;  %s1244_s14 = smov 0  }
   0x7 LB: > { %1478 = sst [smem:[#allocation12_spill]] %s1206_s14  ;;  %s824_s15 = sadd.s32 4294967295, %s1206_s14   ;;  %s1206_s14 = sphi %s1244_s14, %s19_s14   ;;  %s1202_s13 = sphi %s1242_s13, %s1501_s13   ;;  %s1198_s12 = sphi %s1240_s12, %s1500_s12   ;;  %s1194_s11 = sphi %s1238_s11, %s1499_s11   ;;  %s1190_s10 = sphi %s1236_s10, %s1498_s10   ;;  %s1186_s9 = sphi %s1234_s9, %s1497_s9  }
   0x8   : > { %s825_s16 = sadd.s32 4294967294, %s1206_s14   ;;  %p82_p0 = scmp.ne.s32.totalorder %s1194_s11, %s1190_s10 }
   0x9   : > { %p83_p1 = scmp.eq.s32.totalorder %s1206_s14, 0  ;;  %p88_p2 = scmp.ne.s32.totalorder %s1190_s10, %s1186_s9 }
   0xa   : > { %p1272_p3 = scmp.eq.s32.totalorder %s824_s15, 0  ;;  %p114_p4 = scmp.eq.s32.totalorder %s824_s15, 1 }
   0xb   : > { %p1276_p5 = por %p83_p1, %p82_p0  ;;  %p120_p6 = scmp.eq.s32.totalorder %s825_s16, 1 }
   0xc   : > { %s1479_s18 = scalar_select %p1272_p3, 1, 0 }
   0xd   : > { %p1282_p7 = por %p1272_p3, %p88_p2  ;;  %p1286_p8 = por %p114_p4, %p82_p0 }
   0xe   : > { %p1290_p9 = por %p120_p6, %p88_p2  ;;  %p826_p10 = scmp.ge.s32.totalorder %s1206_s14, 1 }
   0xf   : > { %s1481_s20 = scalar_select %p1282_p7, 1, 0 }
  0x10   : > { %s1482_s21 = scalar_select %p1286_p8, 1, 0 }
  0x11   : > { %s1483_s22 = scalar_select %p1290_p9, 1, 0 }
  0x12   : > { %p127_p11 = scmp.lt.s32.totalorder %s1206_s14, 3  ;;  %s1208_s24 = smov [#allocation3]  }
  0x13   : > { %1484 = sst [smem:[#allocation13_spill]] %s1483_s22  ;;  %s145_s25 = sshll.u32 %s1208_s24, 4  ;;  %s146_s25 = int_to_ptr.vmem [resolvable:$true] %s145_s25 }
  0x14   : > { %p1296_p12 = pnand %p826_p10, %p127_p11  ;;  %p941_p1 = scmp.lt.s32.totalorder %s1206_s14, 2 }
  0x15   : > { %s34_s28 = sadd.s32 1, %s1202_s13  ;;  %s1079_s30 = scalar_lea.vmem %s146_s25, 256 }
  0x16   : > { %p928_p13 = pneg %p1296_p12  ;;  %p1312_p2 = pnand %p941_p1, %p1276_p5 }
  0x17   : > { %p1317_p6 = scmp.ge.s32.totalorder %s34_s28, 2  ;;  %p1080_p11 = scmp.ne.s32.totalorder %s146_s25, %s1079_s30 }
  0x18   : > { %p1306_p4 = pnand %p928_p13, %p1272_p3  ;;  %p1087_p9 = scmp.lt.s32.totalorder %s146_s25, %s146_s25 }
  0x19   : > { %p1088_p8 = scmp.lt.s32.totalorder %s1079_s30, %s1079_s30 }
  0x1a   : > { %p1070_p10 = pneg %p1306_p4 }
  0x1b   : > { %p1089_p7 = por %p1088_p8, %p1087_p9 }
  0x1c   : > { %p1082_p0 = pnand %p1080_p11, %p1070_p10 }
  0x1e   : > { %p1083_p13 = pneg %p1082_p0 }
  0x20   : > { %p1090_p3 = pnand %p1089_p7, %p1083_p13 }
  0x22   : > { %1093 = shalt.err (!%p1090_p3)
}
  0x23   : > { %s1209_s3 = smov 128   ;;  %s1210_s4 = smov 8  }
  0x24   : > { %931 = dma.hbm_to_vmem [thread:$0]  (!%p1306_p4), %s1468_s0, 256, %s146_s25, [#allocation4], %s1209_s3, %s1209_s3, %s1210_s4  }
  0x25   : > { %s159_s7 = sand.u32 1, %s1194_s11   ;;  %s1503_s28 = smov (%p1317_p6, %s34_s28), 0 }
  0x26   : > { %s917_s8 = smul.u32 384, %s159_s7  ;;  %s71_s15 = ssub.s32 %s1202_s13, %s1503_s28 }
  0x27   : > { %s889_s16 = smul.u32 192, %s1202_s13  ;;  %p73_p3 = scmp.eq.s32.totalorder %s71_s15, 0 }
  0x28   : > { %s163_s17 = scalar_lea.vmem [#allocation6], %s917_s8  ;;  %s1489_s26 = sadd.s32 1, %s1194_s11 }
  0x29   : > { %s172_s30 = scalar_lea.hbm %s1469_s1, %s889_s16  ;;  %s173_s14 = sshll.u32 %s163_s17, 4  ;;  %s174_s14 = int_to_ptr.vmem [resolvable:$true] %s173_s14 }
  0x2a   : > { %s1342_s22 = scalar_select %p73_p3, %s1194_s11, %s1489_s26  }
  0x2b   : > { %s160_s25 = scalar_lea.sflag [#allocation7], %s159_s7  ;;  %p1096_p5 = pneg %p1312_p2 }
  0x2c   : > { %s1107_s29 = scalar_lea.vmem %s174_s14, 6144  ;;  %s1211_s3 = smov [#allocation6]  }
  0x2d   : > { %p1108_p7 = scmp.ne.s32.totalorder %s174_s14, %s1107_s29  ;;  %s1112_s4 = sshll.u32 %s1211_s3, 4  ;;  %s1113_s4 = int_to_ptr.vmem [resolvable:$false] %s1112_s4 }
  0x2e   : > { %s1114_s5 = scalar_lea.vmem %s1113_s4, 12288  ;;  %p1115_p0 = scmp.lt.s32.totalorder %s174_s14, %s1113_s4 }
  0x2f   : > { %p1110_p8 = pnand %p1108_p7, %p1096_p5  ;;  %p1116_p1 = scmp.lt.s32.totalorder %s1114_s5, %s1107_s29 }
  0x31   : > { %p1111_p9 = pneg %p1110_p8  ;;  %p1117_p4 = por %p1116_p1, %p1115_p0 }
  0x33   : > { %p1118_p6 = pnand %p1117_p4, %p1111_p9 }
  0x35   : > { %1121 = shalt.err (!%p1118_p6)
}
  0x36   : > { %s1212_s17 = smov 384   ;;  %s1213_s6 = smov 192  }
  0x37   : > { %s1214_s8 = smov 12   ;;  %185 = sbr.rel (%p1296_p12) target bundleno = 347 (0x15b), region = 28 }
  0x38   : > { %935 = dma.hbm_to_vmem [thread:$0]  (!%p1312_p2), %s172_s30, 6144, %s174_s14, %s160_s25, %s1212_s17, %s1213_s6, %s1214_s8  }
  0x39   : > { %p1490_p10 = scmp.ne.s32.totalorder (!%p1296_p12), %s1479_s18, 0 }
  0x3c   : > { %1173 = dma.done.wait (%p1490_p10), [#allocation4], 256  }
  0x3d   : > { %1175 = vsyncadd (%p1490_p10), [#allocation4], 4294967040  ;;  %s1355_s7 = sand.u32 1, %s1190_s10   ;;  %p1491_p2 = scmp.ne.s32.totalorder %s1481_s20, 0 }
  0x3e   : > { %s918_s15 = smul.u32 384, %s1355_s7  ;;  %s192_s16 = scalar_lea.sflag [#allocation7], %s1355_s7 }
  0x40   : > { %s1359_s19 = scalar_lea.vmem [#allocation6], %s918_s15 }
  0x41   : > { %1177 = dma.done.wait (%p1491_p2), %s192_s16, 6144  }
  0x42   : > { %1179 = vsyncadd (%p1491_p2), %s192_s16, 4294961152  ;;  %v1001_v0 = vld [vmem:[%s1359_s19 + $0xac] ss:$12 sps:$4 sm:$0xff]   ;;  %v1003_v1 = vld [vmem:[%s1359_s19 + $0xa8] ss:$12 sps:$4 sm:$0xff]   ;;  %s919_s14 = smul.u32 24, %s1355_s7 }
  0x43   : > { %571 = vmatprep.subr.bf16.mxu0 %v1001_v0  ;;  %v1004_v2 = vld [vmem:[%s1359_s19 + $0x94] ss:$12 sps:$4 sm:$0xff]   ;;  %v1006_v3 = vld [vmem:[%s1359_s19 + $0x90] ss:$12 sps:$4 sm:$0xff]   ;;  %v1009_v5 = vld [vmem:[%s1359_s19 + $0x78] ss:$12 sps:$4 sm:$0xff]  }
  0x44   : > { %572 = vmatpush1.bf16.msra.mxu0 %v1003_v1  ;;  %v1007_v4 = vld [vmem:[%s1359_s19 + $0x7c] ss:$12 sps:$4 sm:$0xff]   ;;  %v1010_v6 = vld [vmem:[%s1359_s19 + $0x64] ss:$12 sps:$4 sm:$0xff]   ;;  %v1012_v8 = vld [vmem:[%s1359_s19 + $0x60] ss:$12 sps:$4 sm:$0xff]  }
  0x45   : > { %573 = vmatprep.subr.bf16.mxu0 %v1004_v2  ;;  %v1021_v7 = vld [vmem:[%s1359_s19 + $0x170] ss:$12 sps:$4 sm:$0xff]   ;;  %v1013_v10 = vld [vmem:[%s1359_s19 + $0x4c] ss:$12 sps:$4 sm:$0xff]   ;;  %v1015_v13 = vld [vmem:[%s1359_s19 + $0x48] ss:$12 sps:$4 sm:$0xff]  }
  0x46   : > { %895 = vmatprep.subr.bf16.mxu1 %v1021_v7  ;;  %v1023_v9 = vld [vmem:[%s1359_s19 + $0xb0] ss:$12 sps:$4 sm:$0xff]   ;;  %v1026_v11 = vld [vmem:[%s1359_s19 + $0x158] ss:$12 sps:$4 sm:$0xff]   ;;  %v1016_v14 = vld [vmem:[%s1359_s19 + $0x34] ss:$12 sps:$4 sm:$0xff]  }
  0x47   : > { %896 = vmatpush3.bf16.msra.mxu1 %v1023_v9  ;;  %v1028_v12 = vld [vmem:[%s1359_s19 + $0x98] ss:$12 sps:$4 sm:$0xff]   ;;  %v1031_v15 = vld [vmem:[%s1359_s19 + $0x140] ss:$12 sps:$4 sm:$0xff]   ;;  %v1018_v17 = vld [vmem:[%s1359_s19 + $0x30] ss:$12 sps:$4 sm:$0xff]  }
  0x48   : > { %574 = vmatpush1.bf16.msra.mxu0 %v1006_v3  ;;  %897 = vmatprep.subr.bf16.mxu1 %v1026_v11  ;;  %v1033_v16 = vld [vmem:[%s1359_s19 + $0x80] ss:$12 sps:$4 sm:$0xff]   ;;  %v1036_v18 = vld [vmem:[%s1359_s19 + $0x128] ss:$12 sps:$4 sm:$0xff]   ;;  %v1022_v21 = vld [vmem:[%s1359_s19 + $0x18] ss:$12 sps:$4 sm:$0xff]  }
  0x49   : > { %575 = vmatprep.subr.bf16.mxu0 %v1007_v4  ;;  %v1019_v19 = vld [vmem:[%s1359_s19 + $0x1c] ss:$12 sps:$4 sm:$0xff]   ;;  %v1024_v23 = vld [vmem:[%s1359_s19 + $0x4] ss:$12 sps:$4 sm:$0xff]   ;;  %v1027_v26 = vld [vmem:[%s1359_s19] ss:$12 sps:$4 sm:$0xff]  }
  0x4a   : > { %v1038_v20 = vld [vmem:[%s1359_s19 + $0x68] ss:$12 sps:$4 sm:$0xff]   ;;  %v1041_v22 = vld [vmem:[%s1359_s19 + $0x110] ss:$12 sps:$4 sm:$0xff]   ;;  %v1046_v25 = vld [vmem:[%s1359_s19 + $0xf8] ss:$12 sps:$4 sm:$0xff]  }
  0x4b   : > { %898 = vmatpush3.bf16.msra.mxu1 %v1028_v12  ;;  %v1043_v24 = vld [vmem:[%s1359_s19 + $0x50] ss:$12 sps:$4 sm:$0xff]   ;;  %v1029_v27 = vld [vmem:[%s1359_s19 + $0x16c] ss:$12 sps:$4 sm:$0xff]   ;;  %v1032_v30 = vld [vmem:[%s1359_s19 + $0x168] ss:$12 sps:$4 sm:$0xff]  }
  0x4c   : > { %576 = vmatpush1.bf16.msra.mxu0 %v1009_v5  ;;  %899 = vmatprep.subr.bf16.mxu1 %v1031_v15  ;;  %v1048_v28 = vld [vmem:[%s1359_s19 + $0x38] ss:$12 sps:$4 sm:$0xff]   ;;  %v1051_v29 = vld [vmem:[%s1359_s19 + $0xe0] ss:$12 sps:$4 sm:$0xff]   ;;  %v1056_v33 = vld [vmem:[%s1359_s19 + $0xc8] ss:$12 sps:$4 sm:$0xff]  }
  0x4d   : > { %577 = vmatprep.subr.bf16.mxu0 %v1010_v6  ;;  %v1034_v31 = vld [vmem:[%s1359_s19 + $0x154] ss:$12 sps:$4 sm:$0xff]   ;;  %v1037_v34 = vld [vmem:[%s1359_s19 + $0x150] ss:$12 sps:$4 sm:$0xff]   ;;  %v1042_v38 = vld [vmem:[%s1359_s19 + $0x138] ss:$12 sps:$4 sm:$0xff]  }
  0x4e   : > { %v1053_v32 = vld [vmem:[%s1359_s19 + $0x20] ss:$12 sps:$4 sm:$0xff]   ;;  %v1061_v35 = vld [vmem:[#allocation3 + $0x4] ss:$8 sps:$4 sm:$0xff]   ;;  %v1044_v39 = vld [vmem:[%s1359_s19 + $0x124] ss:$12 sps:$4 sm:$0xff]  }
  0x4f   : > { %900 = vmatpush3.bf16.msra.mxu1 %v1033_v16  ;;  %v1039_v36 = vld [vmem:[%s1359_s19 + $0x13c] ss:$12 sps:$4 sm:$0xff]   ;;  %646 = vmatprep.mubr.bf16.mxu1 %v1061_v35  ;;  %v1059_v40 = vld [vmem:[#allocation3] ss:$8 sps:$4 sm:$0xff]   ;;  %v1047_v41 = vld [vmem:[%s1359_s19 + $0x120] ss:$12 sps:$4 sm:$0xff]  }
  0x50   : > { %578 = vmatpush1.bf16.msra.mxu0 %v1012_v8  ;;  %901 = vmatprep.subr.bf16.mxu1 %v1036_v18  ;;  %v1058_v37 = vld [vmem:[%s1359_s19 + $0x8] ss:$12 sps:$4 sm:$0xff]   ;;  %v1049_v42 = vld [vmem:[%s1359_s19 + $0x10c] ss:$12 sps:$4 sm:$0xff]   ;;  %v1057_v45 = vld [vmem:[%s1359_s19 + $0xf0] ss:$12 sps:$4 sm:$0xff]  }
  0x51   : > { %579 = vmatprep.subr.bf16.mxu0 %v1013_v10  ;;  %603 = vmatprep.mubr.bf16.mxu0 %v1061_v35  ;;  %v1052_v43 = vld [vmem:[%s1359_s19 + $0x108] ss:$12 sps:$4 sm:$0xff]   ;;  %v1064_v47 = vld [vmem:[%s1359_s19 + $0xd8] ss:$12 sps:$4 sm:$0xff]   ;;  %v1067_v49 = vld [vmem:[%s1359_s19 + $0xc0] ss:$12 sps:$4 sm:$0xff]  }
  0x52   : > { %v1054_v44 = vld [vmem:[%s1359_s19 + $0xf4] ss:$12 sps:$4 sm:$0xff]   ;;  %v1062_v46 = vld [vmem:[%s1359_s19 + $0xdc] ss:$12 sps:$4 sm:$0xff]   ;;  %v1065_v48 = vld [vmem:[%s1359_s19 + $0xc4] ss:$12 sps:$4 sm:$0xff]  }
  0x53   : > { %902 = vmatpush3.bf16.msra.mxu1 %v1038_v20  ;;  %s215_s18 = scalar_lea.vmem [#allocation8], %s919_s14  ;;  %s894_s23 = smul.u32 192, %s1198_s12 }
  0x54   : > { %580 = vmatpush1.bf16.msra.mxu0 %v1015_v13  ;;  %903 = vmatprep.subr.bf16.mxu1 %v1041_v22  ;;  %s717_s20 = sshll.u32 %s215_s18, 4  ;;  %s701_s26 = scalar_lea.sflag [#allocation5], %s1355_s7  ;;  %s1415_s20 = int_to_ptr.vmem [resolvable:$true] %s717_s20 }
  0x55   : > { %581 = vmatprep.subr.bf16.mxu0 %v1016_v14  ;;  %s1420_s30 = scalar_lea.hbm %s1470_s2, %s894_s23  ;;  %s1122_s25 = scalar_lea.vmem %s1415_s20, 384 }
  0x56   : > { %p1123_p12 = scmp.ne.s32.totalorder %s1415_s20, %s1122_s25  ;;  %p1492_p11 = scmp.ne.s32.totalorder %s1482_s21, 0 }
  0x57   : > { %904 = vmatpush3.bf16.msra.mxu1 %v1043_v24  ;;  %s1215_s12 = smov [#allocation8]  }
  0x58   : > { %582 = vmatpush1.bf16.msra.mxu0 %v1018_v17  ;;  %905 = vmatprep.subr.bf16.mxu1 %v1046_v25  ;;  %p1124_p13 = pnand %p1123_p12, %p1492_p11  ;;  %s1126_s29 = sshll.u32 %s1215_s12, 4  ;;  %s1127_s29 = int_to_ptr.vmem [resolvable:$false] %s1126_s29 }
  0x59   : > { %583 = vmatprep.subr.bf16.mxu0 %v1019_v19  ;;  %s1128_s3 = scalar_lea.vmem %s1127_s29, 768  ;;  %p1129_p5 = scmp.lt.s32.totalorder %s1415_s20, %s1127_s29 }
  0x5a   : > { %p1125_p3 = pneg %p1124_p13  ;;  %p1130_p7 = scmp.lt.s32.totalorder %s1128_s3, %s1122_s25 }
  0x5b   : > { %906 = vmatpush3.bf16.msra.mxu1 %v1048_v28 }
  0x5c   : > { %584 = vmatpush1.bf16.msra.mxu0 %v1022_v21  ;;  %907 = vmatprep.subr.bf16.mxu1 %v1051_v29  ;;  %p1131_p8 = por %p1130_p7, %p1129_p5 }
  0x5d   : > { %585 = vmatprep.subr.bf16.mxu0 %v1024_v23 }
  0x5e   : > { %p1132_p9 = pnand %p1131_p8, %p1125_p3 }
  0x5f   : > { %908 = vmatpush3.bf16.msra.mxu1 %v1053_v32 }
  0x60   : > { %586 = vmatpush1.bf16.msra.mxu0 %v1027_v26  ;;  %909 = vmatprep.subr.bf16.mxu1 %v1056_v33 }
  0x61   : > { %587 = vmatprep.subr.bf16.mxu0 %v1029_v27 }
  0x63   : > { %910 = vmatpush3.bf16.msra.mxu1 %v1058_v37 }
  0x64   : > { %588 = vmatpush2.bf16.msra.mxu0 %v1032_v30 }
  0x65   : > { %589 = vmatprep.subr.bf16.mxu0 %v1034_v31 }
  0x66   : > { %647 = vmatmul.mubr.bf16.vlgmr.msra.gmra.mxu1 %v1059_v40 }
  0x68   : > { %590 = vmatpush2.bf16.msra.mxu0 %v1037_v34 }
  0x69   : > { %591 = vmatprep.subr.bf16.mxu0 %v1039_v36 }
  0x6c   : > { %592 = vmatpush2.bf16.msra.mxu0 %v1042_v38 }
  0x6d   : > { %593 = vmatprep.subr.bf16.mxu0 %v1044_v39 }
  0x70   : > { %594 = vmatpush2.bf16.msra.mxu0 %v1047_v41 }
  0x71   : > { %595 = vmatprep.subr.bf16.mxu0 %v1049_v42 }
  0x74   : > { %596 = vmatpush2.bf16.msra.mxu0 %v1052_v43 }
  0x75   : > { %597 = vmatprep.subr.bf16.mxu0 %v1054_v44 }
  0x78   : > { %598 = vmatpush2.bf16.msra.mxu0 %v1057_v45 }
  0x79   : > { %599 = vmatprep.subr.bf16.mxu0 %v1062_v46 }
  0x7c   : > { %600 = vmatpush2.bf16.msra.mxu0 %v1064_v47 }
  0x7d   : > { %601 = vmatprep.subr.bf16.mxu0 %v1065_v48 }
  0x80   : > { %602 = vmatpush2.bf16.msra.mxu0 %v1067_v49 }
  0x83   : > { %604 = vmatmul.mubr.bf16.vlgmr.msra.gmra.mxu0 %v1059_v40 }
 0x126   : > { %v911_v50 = vpop.f32.mrf.mxu1 }
 0x128   : > { %v912_v51 = vpop.f32.mrf.mxu1 }
 0x129   : > { %v913_v52 = vadd.f32 %v912_v51, %v911_v50 }
 0x12a   : > { %v914_v53 = vpop.f32.mrf.mxu1 }
 0x12b   : > { %v891_v54 = vpack.c.bf16 %v913_v52, %v913_v52 }
 0x12c   : > { %v915_v55 = vpop.f32.mrf.mxu1 }
 0x12d   : > { %697 = vst [vmem:[%s215_s18 + $0x8] sm:$0xf] %v891_v54  ;;  %v916_v56 = vadd.f32 %v915_v55, %v914_v53 }
 0x12f   : > { %v893_v57 = vpack.c.bf16 %v916_v56, %v916_v56 }
 0x131   : > { %699 = vst [vmem:[%s215_s18 + $0x14] sm:$0xf] %v893_v57 }
 0x143   : > { %v605_v58 = vpop.f32.mrf.mxu0 }
 0x145   : > { %v607_v59 = vpop.f32.mrf.mxu0 }
 0x146   : > { %v890_v60 = vpack.c.bf16 %v607_v59, %v605_v58 }
 0x147   : > { %v609_v61 = vpop.f32.mrf.mxu0 }
 0x148   : > { %696 = vst [vmem:[%s215_s18] sm:$0xff] %v890_v60 }
 0x149   : > { %v611_v62 = vpop.f32.mrf.mxu0 }
 0x14a   : > { %v892_v63 = vpack.c.bf16 %v611_v62, %v609_v61 }
 0x14c   : > { %698 = vst [vmem:[%s215_s18 + $0xc] sm:$0xff] %v892_v63 }
 0x14d   : > { %1135 = shalt.err (!%p1132_p9)
}
 0x14e   : > { %s1136_s4 = scalar_lea.hbm %s1420_s30, 384  ;;  %s1140_s6 = scalar_lea.hbm %s1470_s2, 768 }
 0x14f   : > { %p1137_p0 = scmp.ne.s32.totalorder %s1420_s30, %s1136_s4  ;;  %p1141_p6 = scmp.lt.s32.totalorder %s1420_s30, %s1470_s2 }
 0x150   : > { %p1142_p10 = scmp.lt.s32.totalorder %s1140_s6, %s1136_s4 }
 0x151   : > { %p1138_p1 = pnand %p1137_p0, %p1492_p11 }
 0x152   : > { %p1143_p2 = por %p1142_p10, %p1141_p6 }
 0x153   : > { %p1139_p4 = pneg %p1138_p1 }
 0x155   : > { %p1144_p12 = pnand %p1143_p2, %p1139_p4 }
 0x157   : > { %1147 = shalt.err (!%p1144_p12)
}
 0x158   : > { %s1216_s16 = smov 192   ;;  %s1217_s19 = smov 384  }
 0x159   : > { %s1218_s14 = smov 12  }
 0x15a   : > { %926 = dma.vmem_to_hbm [thread:$0]  (%p1492_p11), %s1415_s20, 384, %s1420_s30, %s701_s26, %s1216_s16, %s1217_s19, %s1218_s14  }
 0x15b PF: > { %s1493_s18 = sld [smem:[#allocation13_spill]]  ;;  %s732_s27 = sand.u32 1, %s1186_s9  }
 0x15c   : > { %s1494_s23 = sld [smem:[#allocation12_spill]]  ;;  %s733_s24 = scalar_lea.sflag [#allocation5], %s732_s27 }
 0x161   : > { %p1495_p13 = scmp.ne.s32.totalorder %s1493_s18, 0 }
 0x162   : > { %p1496_p3 = scmp.ge.s32.totalorder %s1494_s23, 2 }
 0x164   : > { %p937_p5 = pnand %p1496_p3, %p1495_p13 }
 0x166   : > { %p938_p7 = pneg %p937_p5 }
 0x168   : > { %1181 = dma.done.wait (%p938_p7), %s733_s24, 384  }
 0x169   : > { %1183 = vsyncadd (%p938_p7), %s733_s24, 4294966912  ;;  %s19_s14 = sadd.s32 1, %s1494_s23   ;;  %s1497_s9 = smov %s1190_s10 }
 0x16a   : > { %p16_p8 = scmp.ge.s32.totalorder %s19_s14, 4   ;;  %s1498_s10 = smov %s1194_s11 }
 0x16b   : > { %s1499_s11 = smov %s1342_s22  ;;  %s1500_s12 = smov %s1202_s13 }
 0x16c   : > { %s1501_s13 = smov %s1503_s28  ;;  %18 = sbr.rel (!%p16_p8) target bundleno = 7 (0x7), region = 87 }
 0x171   :  { %738 = vsyncpa [#allocation4], 1 }
 0x172   :  { %740 = vsyncpa [#allocation4 + $0x1], 1 }
 0x173   :  { %741 = vsyncpa [#allocation7], 1 }
 0x174   :  { %743 = vsyncpa [#allocation7 + $0x1], 1 }
 0x175   :  { %744 = vsyncpa [#allocation5], 1 }
 0x176   :  { %746 = vsyncpa [#allocation5 + $0x1], 1 }

</bundles_post_ra>
